<compile_context>
chip_gen: v6e
topology: v6e:2x2x1
jax: 0.10.0
libtpu: 0.0.40
codegen_flags: <defaults>
</compile_context>

<pallas_src>
import functools

import jax
import jax.numpy as jnp
from jax.experimental import pallas as pl
from jax.experimental.pallas import tpu as pltpu


def _round_up(x: int, m: int) -> int:
    return (x + m - 1) // m * m


def _cdiv(a: int, b: int) -> int:
    return (a + b - 1) // b


def _vmem_capacity_bytes() -> int:
    # Per-generation VMEM capacity (128 MiB on v5e/v6e, 64 MiB per TC on v7x).
    try:
        return int(pltpu.get_tpu_info().vmem_capacity_bytes)
    except Exception:
        return 64 << 20  # conservative fallback (v7x per-TensorCore VMEM)


def mlp_kernel(x_ref, w1_ref, b1_ref, w2_ref, b2_ref, o_ref):
    # hidden = relu(x @ W1 + b1): MXU matmul with f32 accumulation; bias-add +
    # ReLU kept in f32 on the VPU (required on v5e -- no bf16 VALU there --
    # and a cheap epilogue everywhere).
    h = jnp.dot(x_ref[...], w1_ref[...], preferred_element_type=jnp.float32)
    h = jnp.maximum(h + b1_ref[...], 0.0)
    # Single cast immediately before the second dot keeps the (bf16) MXU path
    # fed without moving the epilogue off f32.
    o = jnp.dot(h.astype(w2_ref.dtype), w2_ref[...],
                preferred_element_type=jnp.float32)
    o_ref[...] = (o + b2_ref[...]).astype(o_ref.dtype)
    # TODO(synk): for hidden >= ~4k, chunk over hid_p here (dot a W1 chunk,
    # bias+ReLU+cast per chunk, accumulate the second dot in f32) to bound the
    # live [bm, hid_p] scratch instead of materializing full h + its cast.


def prepare_mlp_params(w1, b1, w2, b2, *, compute_dtype=jnp.bfloat16):
    """Pad + cast the weights ONCE (hoisted out of the per-call path).

    W1: [in_dim, hidden]   b1: [hidden] or [1, hidden]
    W2: [hidden, out_dim]  b2: [out_dim] or [1, out_dim]

    hidden / out_dim are zero-padded to multiples of 128 (MXU-friendly tiles,
    unmasked lane-dense `vst` stores). in_dim is deliberately left unpadded:
    the kernel's K blocks use the full-extent dim and Mosaic pads K in VMEM.
    Zero padding is exact: padded hidden cols give relu(0 + 0) = 0 and padded
    output cols are sliced away in mlp_apply().
    """
    in_dim, hidden = w1.shape
    out_dim = w2.shape[1]
    hid_p = _round_up(hidden, 128)
    out_p = _round_up(out_dim, 128)

    w1p = jnp.pad(w1.astype(compute_dtype), ((0, 0), (0, hid_p - hidden)))
    w2p = jnp.pad(w2.astype(compute_dtype),
                  ((0, hid_p - hidden), (0, out_p - out_dim)))
    # Biases stay f32: they feed the f32 epilogue.
    b1p = jnp.pad(b1.reshape(1, -1).astype(jnp.float32),
                  ((0, 0), (0, hid_p - hidden)))
    b2p = jnp.pad(b2.reshape(1, -1).astype(jnp.float32),
                  ((0, 0), (0, out_p - out_dim)))
    # TODO(synk): v7x fp8 weight option (per-output-channel scales folded into
    # the f32 bias epilogue) would halve resident weight VMEM / double MXU rate.
    return {"w1": w1p, "b1": b1p, "w2": w2p, "b2": b2p,
            "in_dim": int(in_dim), "hidden": int(hidden), "out_dim": int(out_dim)}


@functools.partial(jax.jit, static_argnames=("out_dim", "block_m"))
def _mlp_forward_padded(x, w1p, b1p, w2p, b2p, *, out_dim, block_m):
    out_dtype = x.dtype
    batch, in_dim = x.shape
    assert w1p.shape[0] == in_dim, "x / W1 inner dimension mismatch"
    hid_p = w1p.shape[1]
    out_p = w2p.shape[1]
    compute_dtype = w1p.dtype

    # ---- M-tile selection --------------------------------------------------
    w_isz = jnp.dtype(compute_dtype).itemsize
    pack = {4: 8, 2: 16, 1: 32}.get(w_isz, 8)      # sublane packing of the tile
    steps = max(_cdiv(batch, block_m), 1)
    # v7x has 2 TensorCores: make the "parallel" M axis span both whenever the
    # batch is large enough for two packed tiles.
    if steps == 1 and batch >= 2 * pack:
        steps = 2
    bm = _round_up(_cdiv(batch, steps), pack)       # minimal-waste packed tile
    grid_m = _cdiv(batch, bm)
    batch_p = grid_m * bm

    # Cast + (minimal) batch pad of the activation stream only.
    xp = x.astype(compute_dtype)
    if batch_p != batch:
        xp = jnp.pad(xp, ((0, batch_p - batch), (0, 0)))

    # ---- VMEM budget (single-buffered weights, double-buffered x / out) -----
    x_isz = w_isz
    o_isz = jnp.dtype(out_dtype).itemsize
    resident = (in_dim * hid_p + hid_p * out_p) * w_isz + (hid_p + out_p) * 4
    streamed = 2 * bm * in_dim * x_isz + 2 * bm * out_p * o_isz
    scratch = bm * hid_p * 4 + bm * hid_p * w_isz   # f32 h + its cast copy
    needed = resident + streamed + scratch
    cap = _vmem_capacity_bytes()
    reserve = 4 << 20                               # Mosaic internal scratch
    assert needed + reserve <= cap, (
        f"MLP weights do not fit VMEM-resident ({needed >> 20} MiB needed, "
        f"{cap >> 20} MiB capacity); a K/hidden grid axis is required.")
    # TODO(synk): K/hidden grid-axis fallback (f32 VMEM accumulator + pl.when
    # init/epilogue) for weights that outgrow VMEM residency (esp. v7x 64 MiB).
    vmem_bytes = int(min(max(needed + (16 << 20), 32 << 20), cap - reserve))

    cost = pl.CostEstimate(
        flops=2 * batch_p * (in_dim * hid_p + hid_p * out_p),
        transcendentals=0,
        bytes_accessed=int(xp.size * x_isz + w1p.size * w_isz
                           + w2p.size * w_isz + (hid_p + out_p) * 4
                           + batch_p * out_p * o_isz),
    )

    resident_mode = pl.Buffered(1)   # constant index_map -> no double buffer
    out_padded = pl.pallas_call(
        mlp_kernel,
        out_shape=jax.ShapeDtypeStruct((batch_p, out_p), out_dtype),
        grid_spec=pltpu.PrefetchScalarGridSpec(
            num_scalar_prefetch=0,
            grid=(grid_m,),
            in_specs=[
                pl.BlockSpec((bm, in_dim), lambda i: (i, 0)),       # streamed x
                pl.BlockSpec((in_dim, hid_p), lambda i: (0, 0),
                             pipeline_mode=resident_mode),          # resident W1
                pl.BlockSpec((1, hid_p), lambda i: (0, 0),
                             pipeline_mode=resident_mode),          # resident b1
                pl.BlockSpec((hid_p, out_p), lambda i: (0, 0),
                             pipeline_mode=resident_mode),          # resident W2
                pl.BlockSpec((1, out_p), lambda i: (0, 0),
                             pipeline_mode=resident_mode),          # resident b2
            ],
            out_specs=pl.BlockSpec((bm, out_p), lambda i: (i, 0)),
        ),
        compiler_params=pltpu.CompilerParams(
            dimension_semantics=("parallel",),
            vmem_limit_bytes=vmem_bytes,
        ),
        cost_estimate=cost,
    )(xp, w1p, b1p, w2p, b2p)

    # Strip padding back to the logical shape.
    return out_padded[:batch, :out_dim]


def mlp_apply(x, params, *, block_m: int = 256):
    """Forward with pre-padded / pre-cast params from prepare_mlp_params()."""
    return _mlp_forward_padded(x, params["w1"], params["b1"],
                               params["w2"], params["b2"],
                               out_dim=params["out_dim"], block_m=block_m)


def mlp_forward(x, w1, b1, w2, b2, *, compute_dtype=jnp.bfloat16,
                block_m: int = 256):
    """One-shot convenience wrapper.

    Prefer prepare_mlp_params() once + mlp_apply() per step so the weight
    pad/cast HBM traffic is not paid on every forward.
    """
    params = prepare_mlp_params(w1, b1, w2, b2, compute_dtype=compute_dtype)
    return mlp_apply(x, params, block_m=block_m)


def mlp_reference(x, w1, b1, w2, b2):
    h = jnp.maximum(x @ w1 + b1.reshape(1, -1), 0.0)
    return h @ w2 + b2.reshape(1, -1)


if __name__ == "__main__":
    # Small, deterministic shapes consistent with an MLP forward.
    batch, in_dim, hidden, out_dim = 8, 32, 64, 16

    key = jax.random.PRNGKey(0)
    kx, kw1, kb1, kw2, kb2 = jax.random.split(key, 5)

    x = jax.random.normal(kx, (batch, in_dim), dtype=jnp.float32)
    w1 = jax.random.normal(kw1, (in_dim, hidden), dtype=jnp.float32) * 0.1
    b1 = jax.random.normal(kb1, (1, hidden), dtype=jnp.float32) * 0.01
    w2 = jax.random.normal(kw2, (hidden, out_dim), dtype=jnp.float32) * 0.1
    b2 = jax.random.normal(kb2, (1, out_dim), dtype=jnp.float32) * 0.01

    ref = mlp_reference(x, w1, b1, w2, b2)

    # Preferred path: pad/cast weights once (bf16 MXU default), stream x only.
    params_bf16 = prepare_mlp_params(w1, b1, w2, b2, compute_dtype=jnp.bfloat16)
    out_bf16 = mlp_apply(x, params_bf16)
    jax.block_until_ready(out_bf16)
    assert out_bf16.shape == (batch, out_dim)
    assert jnp.allclose(out_bf16, ref, atol=5e-2, rtol=5e-2)

    # f32 MXU path: exactness check against the pure-JAX reference.
    out_f32 = mlp_forward(x, w1, b1, w2, b2, compute_dtype=jnp.float32)
    jax.block_until_ready(out_f32)
    assert out_f32.shape == (batch, out_dim)
    assert jnp.allclose(out_f32, ref, atol=1e-4, rtol=1e-4)

    print("KERNEL_OK")
</pallas_src>

<mosaic_0001>
module attributes {stable_mosaic.version = 11 : i64} {
  func.func @mlp_kernel(%arg0: i32, %arg1: memref<16x32xbf16, #tpu.memory_space<vmem>>, %arg2: memref<32x128xbf16, #tpu.memory_space<vmem>>, %arg3: memref<1x128xf32, #tpu.memory_space<vmem>>, %arg4: memref<128x128xbf16, #tpu.memory_space<vmem>>, %arg5: memref<1x128xf32, #tpu.memory_space<vmem>>, %arg6: memref<16x128xf32, #tpu.memory_space<vmem>>) attributes {dimension_semantics = [#tpu.dimension_semantics<parallel>], iteration_bounds = array<i64: 1>, scalar_prefetch = 0 : i64, scratch_operands = 0 : i64, tpu.core_type = #tpu.core_type<tc>, window_params = [{transform_indices = @transform_0, window_bounds = array<i64: 16, 32>}, {pipeline_mode = #tpu.pipeline_mode<synchronous>, transform_indices = @transform_1, window_bounds = array<i64: 32, 128>}, {pipeline_mode = #tpu.pipeline_mode<synchronous>, transform_indices = @transform_2, window_bounds = array<i64: 1, 128>}, {pipeline_mode = #tpu.pipeline_mode<synchronous>, transform_indices = @transform_3, window_bounds = array<i64: 128, 128>}, {pipeline_mode = #tpu.pipeline_mode<synchronous>, transform_indices = @transform_4, window_bounds = array<i64: 1, 128>}, {transform_indices = @transform_5, window_bounds = array<i64: 16, 128>}]} {
    %c0 = arith.constant 0 : index
    %c0_0 = arith.constant 0 : index
    %0 = vector.load %arg1[%c0, %c0_0] : memref<16x32xbf16, #tpu.memory_space<vmem>>, vector<16x32xbf16>
    %c0_1 = arith.constant 0 : index
    %c0_2 = arith.constant 0 : index
    %1 = vector.load %arg2[%c0_1, %c0_2] : memref<32x128xbf16, #tpu.memory_space<vmem>>, vector<32x128xbf16>
    %cst = arith.constant dense<0.000000e+00> : vector<16x128xf32>
    %2 = tpu.matmul %0, %1, %cst {dimension_numbers = #tpu.dot_dimension_numbers<[1], [0], [0], [1], [0, 0, 1, 1], [], []>} : vector<16x32xbf16>, vector<32x128xbf16>, vector<16x128xf32> -> vector<16x128xf32>
    %c0_3 = arith.constant 0 : index
    %c0_4 = arith.constant 0 : index
    %3 = vector.load %arg3[%c0_3, %c0_4] : memref<1x128xf32, #tpu.memory_space<vmem>>, vector<1x128xf32>
    %4 = vector.broadcast %3 : vector<1x128xf32> to vector<16x128xf32>
    %5 = arith.addf %2, %4 : vector<16x128xf32>
    %cst_5 = arith.constant 0.000000e+00 : f32
    %6 = vector.broadcast %cst_5 : f32 to vector<16x128xf32>
    %7 = arith.maximumf %5, %6 : vector<16x128xf32>
    %8 = arith.truncf %7 : vector<16x128xf32> to vector<16x128xbf16>
    %c0_6 = arith.constant 0 : index
    %c0_7 = arith.constant 0 : index
    %9 = vector.load %arg4[%c0_6, %c0_7] : memref<128x128xbf16, #tpu.memory_space<vmem>>, vector<128x128xbf16>
    %cst_8 = arith.constant dense<0.000000e+00> : vector<16x128xf32>
    %10 = tpu.matmul %8, %9, %cst_8 {dimension_numbers = #tpu.dot_dimension_numbers<[1], [0], [0], [1], [0, 0, 1, 1], [], []>} : vector<16x128xbf16>, vector<128x128xbf16>, vector<16x128xf32> -> vector<16x128xf32>
    %c0_9 = arith.constant 0 : index
    %c0_10 = arith.constant 0 : index
    %11 = vector.load %arg5[%c0_9, %c0_10] : memref<1x128xf32, #tpu.memory_space<vmem>>, vector<1x128xf32>
    %12 = vector.broadcast %11 : vector<1x128xf32> to vector<16x128xf32>
    %13 = arith.addf %10, %12 : vector<16x128xf32>
    %c0_11 = arith.constant 0 : index
    %c0_12 = arith.constant 0 : index
    %14 = vector.load %arg6[%c0_11, %c0_12] : memref<16x128xf32, #tpu.memory_space<vmem>>, vector<16x128xf32>
    tpu.vector_store %arg6[%c0_11, %c0_12], %13 {strides = array<i32>} : memref<16x128xf32, #tpu.memory_space<vmem>>, vector<16x128xf32>,
    return
  }
  func.func @transform_0(%arg0: i32) -> (i32, i32) {
    %c0_i32 = arith.constant 0 : i32
    %c0_i32_0 = arith.constant 0 : i32
    return %arg0, %c0_i32 : i32, i32
  }
  func.func @transform_1(%arg0: i32) -> (i32, i32) {
    %c0_i32 = arith.constant 0 : i32
    %c0_i32_0 = arith.constant 0 : i32
    %c0_i32_1 = arith.constant 0 : i32
    return %c0_i32, %c0_i32_0 : i32, i32
  }
  func.func @transform_2(%arg0: i32) -> (i32, i32) {
    %c0_i32 = arith.constant 0 : i32
    %c0_i32_0 = arith.constant 0 : i32
    %c0_i32_1 = arith.constant 0 : i32
    return %c0_i32, %c0_i32_0 : i32, i32
  }
  func.func @transform_3(%arg0: i32) -> (i32, i32) {
    %c0_i32 = arith.constant 0 : i32
    %c0_i32_0 = arith.constant 0 : i32
    %c0_i32_1 = arith.constant 0 : i32
    return %c0_i32, %c0_i32_0 : i32, i32
  }
  func.func @transform_4(%arg0: i32) -> (i32, i32) {
    %c0_i32 = arith.constant 0 : i32
    %c0_i32_0 = arith.constant 0 : i32
    %c0_i32_1 = arith.constant 0 : i32
    return %c0_i32, %c0_i32_0 : i32, i32
  }
  func.func @transform_5(%arg0: i32) -> (i32, i32) {
    %c0_i32 = arith.constant 0 : i32
    %c0_i32_0 = arith.constant 0 : i32
    return %arg0, %c0_i32 : i32, i32
  }
}

</mosaic_0001>

<bundles_post_ra>
// kernel: _mlp_forward_padded.1
= control target key start
LH: loop header
LB: loop body
LE: loop exit
PB: predicated region body
PF: predicated region fallthrough
CT: control target
= control target key end

     0   :  { %10 = vsyncpa [#allocation3], 0  ;;  %s324_s18 = smov [#allocation2]   ;;  %s383_s0 = inlined_call_operand.vmem [shape: bf16[16,32], index: 0, kind: input, shape index: {}]   ;;  %s384_s1 = inlined_call_operand.vmem [shape: bf16[32,128], index: 1, kind: input, shape index: {}]   ;;  %s385_s2 = inlined_call_operand.vmem [shape: f32[1,128], index: 2, kind: input, shape index: {}]   ;;  %s386_s3 = inlined_call_operand.hbm [shape: bf16[128,128], index: 3, kind: input, shape index: {}]   ;;  %s387_s4 = inlined_call_operand.vmem [shape: f32[1,128], index: 4, kind: input, shape index: {}]   ;;  %s388_s5 = inlined_call_operand.vmem [shape: f32[16,128], index: 5, kind: output, shape index: {}]  }
   0x1   :  { %s22_s19 = sshll.u32 %s324_s18, 4  ;;  %s23_s19 = int_to_ptr.vmem [resolvable:$true] %s22_s19 }
   0x2   :  { %s310_s20 = scalar_lea.vmem %s23_s19, 1024  ;;  %p315_p1 = scmp.lt.s32.totalorder %s23_s19, %s23_s19 }
   0x3   :  { %p311_p0 = scmp.ne.s32.totalorder %s23_s19, %s310_s20  ;;  %p316_p2 = scmp.lt.s32.totalorder %s310_s20, %s310_s20 }
   0x5   :  { %p317_p3 = por %p316_p2, %p315_p1 }
   0x7   :  { %p318_p4 = pnand %p317_p3, %p311_p0 }
   0x9   :  { %321 = shalt.err (!%p318_p4)
}
   0xa   :  { %s325_s21 = smov 64   ;;  %s326_s22 = smov 4  }
   0xb   :  { %28 = dma.hbm_to_vmem [thread:$0]  %s386_s3, 1024, %s23_s19, [#allocation3], %s325_s21, %s325_s21, %s326_s22  }
   0xc   :  { %322 = dma.done.wait [#allocation3], 1024  }
   0xd   :  { %323 = vsyncadd [#allocation3], 4294966272  ;;  %v327_v0 = vmov 0.0   ;;  %vm328_vm0 = vmmov 0   ;;  %v291_v1 = vld [vmem:[%s384_s1 + $0x8] sm:$0xff]   ;;  %v292_v2 = vld [vmem:[%s384_s1] sm:$0xff]  }
   0xe   :  { %258 = vmatprep.subr.bf16.mxu0 %v327_v0  ;;  %262 = vmatprep.mubr.msk.bf16.mxu0 %vm328_vm0, %v327_v0  ;;  %v294_v3 = vld [vmem:[#allocation2 + $0x38] sm:$0xff]   ;;  %v293_v4 = vld [vmem:[%s383_s0] sm:$0xff]   ;;  %v295_v5 = vld [vmem:[#allocation2 + $0x30] sm:$0xff]   ;;  %vm65_vm1 = vcmask 261120  }
   0xf   :  { %266 = vmatprep.subr.bf16.mxu1 %v327_v0  ;;  %282 = vmatprep.mubr.msk.bf16.mxu1 %vm328_vm0, %v327_v0  ;;  %v296_v6 = vld [vmem:[#allocation2 + $0x28] sm:$0xff]   ;;  %v297_v7 = vld [vmem:[#allocation2 + $0x20] sm:$0xff]   ;;  %v298_v8 = vld [vmem:[#allocation2 + $0x18] sm:$0xff]  }
  0x10   :  { %259 = vmatpush3.bf16.msra.mxu0 %v291_v1  ;;  %267 = vmatpush3.bf16.msra.mxu1 %v294_v3  ;;  %v299_v9 = vld [vmem:[#allocation2 + $0x10] sm:$0xff]   ;;  %v300_v10 = vld [vmem:[#allocation2 + $0x8] sm:$0xff]   ;;  %v301_v11 = vld [vmem:[#allocation2] sm:$0xff]  }
  0x11   :  { %260 = vmatprep.subr.bf16.mxu0 %v327_v0  ;;  %268 = vmatprep.subr.bf16.mxu1 %v327_v0  ;;  %v232_v12 = vld [vmem:[%s385_s2] ss:$0 sm:$0xff] }
  0x12   :  { %v237_v22 = vld [vmem:[%s387_s4] ss:$0 sm:$0xff] }
  0x14   :  { %261 = vmatpush3.bf16.msra.mxu0 %v292_v2  ;;  %269 = vmatpush3.bf16.msra.mxu1 %v295_v5 }
  0x15   :  { %270 = vmatprep.subr.bf16.mxu1 %v327_v0 }
  0x17   :  { %263 = vmatmul.mubr.msk.bf16.vlgmr.msra.gmra.mxu0 %vm65_vm1, %v293_v4 }
  0x18   :  { %271 = vmatpush3.bf16.msra.mxu1 %v296_v6 }
  0x19   :  { %272 = vmatprep.subr.bf16.mxu1 %v327_v0 }
  0x1c   :  { %273 = vmatpush3.bf16.msra.mxu1 %v297_v7 }
  0x1d   :  { %274 = vmatprep.subr.bf16.mxu1 %v327_v0 }
  0x20   :  { %275 = vmatpush3.bf16.msra.mxu1 %v298_v8 }
  0x21   :  { %276 = vmatprep.subr.bf16.mxu1 %v327_v0 }
  0x24   :  { %277 = vmatpush3.bf16.msra.mxu1 %v299_v9 }
  0x25   :  { %278 = vmatprep.subr.bf16.mxu1 %v327_v0 }
  0x28   :  { %279 = vmatpush3.bf16.msra.mxu1 %v300_v10 }
  0x29   :  { %280 = vmatprep.subr.bf16.mxu1 %v327_v0 }
  0x2c   :  { %281 = vmatpush3.bf16.msra.mxu1 %v301_v11 }
  0xd7   :  { %v103_v13 = vpop.f32.mrf.mxu0 }
  0xd8   :  { %v104_v15 = vadd.f32 %v232_v12, %v103_v13 }
  0xd9   :  { %v264_v14 = vpop.f32.mrf.mxu0 }
  0xda   :  { %v110_v19 = vmax.f32 %v104_v15, 0.0 }
  0xdb   :  { %v106_v16 = vpop.f32.mrf.mxu0 }
  0xdc   :  { %v107_v17 = vadd.f32 %v232_v12, %v106_v16 }
  0xdd   :  { %v265_v18 = vpop.f32.mrf.mxu0 }
  0xde   :  { %v111_v20 = vmax.f32 %v107_v17, 0.0 }
  0xe0   :  { %v112_v21 = vpack.c.bf16 %v111_v20, %v110_v19 }
  0xe2   :  { %283 = vmatmul.mubr.bf16.vlgmr.msra.gmra.mxu1 %v112_v21 }
 0x1a2   :  { %v218_v23 = vpop.f32.mrf.mxu1 }
 0x1a3   :  { %v219_v24 = vadd.f32 %v237_v22, %v218_v23 }
 0x1a4   :  { %v284_v25 = vpop.f32.mrf.mxu1 }
 0x1a5   :  { %225 = vst [vmem:[%s388_s5] sm:$0xff] %v219_v24 }
 0x1a6   :  { %v221_v26 = vpop.f32.mrf.mxu1 }
 0x1a7   :  { %v222_v27 = vadd.f32 %v237_v22, %v221_v26 }
 0x1a8   :  { %v285_v28 = vpop.f32.mrf.mxu1 }
 0x1a9   :  { %226 = vst [vmem:[%s388_s5 + $0x8] sm:$0xff] %v222_v27 }
 0x1aa   :  { %231 = vsyncpa [#allocation3], 1 }

</bundles_post_ra>
